<compile_context>
chip_gen: v5e
topology: v5e:2x2
jax: 0.10.0
libtpu: 0.0.40
codegen_flags: <defaults>
</compile_context>

<pallas_src>
import functools

import jax
import jax.numpy as jnp
from jax.experimental import pallas as pl
from jax.experimental.pallas import tpu as pltpu


# --------------------------------------------------------------------------- helpers

_VMEM_LIMIT = 32 * 1024 * 1024  # safe on v5e/v6e/v7x; raises v5e's 16 MiB scoped default.


def _round_up(x, m):
    return ((x + m - 1) // m) * m


def _pad2(a, rows, cols):
    r, c = a.shape
    if r == rows and c == cols:
        return a
    return jnp.pad(a, ((0, rows - r), (0, cols - c)))


def _tile_and_pad(dim, cap, align):
    """Pick a tile for `dim`: full dim if small, else the largest exact divisor that is
    a multiple of `align` and <= cap (no padding), else fall back to padding."""
    if dim <= cap:
        return dim, dim
    start = cap - (cap % align)
    for t in range(start, align - 1, -align):
        if dim % t == 0:
            return t, dim
    return cap, _round_up(dim, cap)


def _pick_q_tile(n, cap=256):
    """Largest divisor of n that is a multiple of 16 (then 8) and <= cap, else n."""
    if n <= cap:
        return n
    for align in (16, 8):
        start = cap - (cap % align)
        for t in range(start, align - 1, -align):
            if n % t == 0:
                return t
    return n


# --------------------------------------------------------------------------- kernels

def _mm_kernel(x_ref, w_ref, b_ref, o_ref, acc_ref):
    # x: (tm, tk), w: (tk, tn) bf16, b: (1, tn) f32 -> o: (tm, tn). K streamed on axis 2.
    k = pl.program_id(2)

    @pl.when(k == 0)
    def _():
        acc_ref[...] = jnp.zeros_like(acc_ref)

    acc_ref[...] += jnp.dot(x_ref[...].astype(jnp.bfloat16), w_ref[...],
                            preferred_element_type=jnp.float32)

    @pl.when(k == pl.num_programs(2) - 1)
    def _():
        o_ref[...] = (acc_ref[...] + b_ref[...]).astype(o_ref.dtype)


def _mm_ln_kernel(x_ref, w_ref, b_ref, g_ref, be_ref, o_ref, acc_ref, *, eps):
    # Matmul with LayerNorm fused into the epilogue (full output width per block).
    k = pl.program_id(1)

    @pl.when(k == 0)
    def _():
        acc_ref[...] = jnp.zeros_like(acc_ref)

    acc_ref[...] += jnp.dot(x_ref[...].astype(jnp.bfloat16), w_ref[...],
                            preferred_element_type=jnp.float32)

    @pl.when(k == pl.num_programs(1) - 1)
    def _():
        y = acc_ref[...] + b_ref[...]
        mean = jnp.mean(y, axis=-1, keepdims=True)
        var = jnp.mean((y - mean) ** 2, axis=-1, keepdims=True)
        yn = (y - mean) * jax.lax.rsqrt(var + eps)
        o_ref[...] = (yn * g_ref[...] + be_ref[...]).astype(o_ref.dtype)


def _attn_kernel(x_ref, kv_ref, qw_ref, qb_ref, pw_ref, pb_ref, o_ref,
                 k_s, v_s, head_s, *, num_heads, head_dim):
    # x:  (1, tq, C)  tokens feeding the fused q projection
    # kv: (1, Nk, 2C) bf16, constant across the q-tile grid axis
    # qw/pw: (C, C) bf16 (attention scale pre-folded into qw/qb); qb/pb: (1, C) f32
    # o:  (1, tq, C)
    C = num_heads * head_dim

    # Hoist the per-head k/v lane extraction out of the q-tile loop: the persistent
    # scratches are refilled only on the first q-tile of each batch.
    @pl.when(pl.program_id(1) == 0)
    def _():
        kv = kv_ref[0].astype(jnp.bfloat16)                        # (Nk, 2C)
        for h in range(num_heads):
            lo = h * head_dim
            k_s[h] = kv[:, lo:lo + head_dim]                       # (Nk, hd)
            v_s[h] = kv[:, C + lo:C + lo + head_dim]               # (Nk, hd)

    # Fused q projection (attention scale already folded into qw/qb): (tq, C) f32.
    q = jnp.dot(x_ref[0].astype(jnp.bfloat16), qw_ref[...],
                preferred_element_type=jnp.float32) + qb_ref[...]

    # TODO(synk): per-head dots contract only head_dim of the MXU width; a head-major
    # (B, nh, N, hd) layout with heads as a grid axis would feed the MXU better but
    # breaks the fused q/proj prologue/epilogue used here.
    for h in range(num_heads):                                     # static unroll
        lo = h * head_dim
        qh = q[:, lo:lo + head_dim].astype(jnp.bfloat16)           # (tq, hd)
        # q @ k^T via dot_general contracting the last dims (no transpose materialized).
        s = jax.lax.dot_general(qh, k_s[h], (((1,), (1,)), ((), ())),
                                preferred_element_type=jnp.float32)    # (tq, Nk)
        s = s - jnp.max(s, axis=-1, keepdims=True)
        p = jnp.exp(s)
        p = p * pl.reciprocal(jnp.sum(p, axis=-1, keepdims=True), approx=True)
        head_s[:, lo:lo + head_dim] = jnp.dot(p.astype(jnp.bfloat16), v_s[h],
                                              preferred_element_type=jnp.float32)

    # Fused output projection + single lane-dense (tq, C) store.
    o_ref[0] = (jnp.dot(head_s[...].astype(jnp.bfloat16), pw_ref[...],
                        preferred_element_type=jnp.float32)
                + pb_ref[...]).astype(o_ref.dtype)


# --------------------------------------------------------------------------- wrappers

def linear(x, w_bf16, b_f32, *, out_dtype=None, tm_cap=512, tn_cap=512, tk_cap=1024):
    """x: (M, K) @ w: (K, N) + b -> (M, N). Tiled/pipelined; bf16 MXU, f32 accumulate."""
    M, K = x.shape
    N = w_bf16.shape[1]
    out_dtype = out_dtype or x.dtype
    tm, Mp = _tile_and_pad(M, tm_cap, 8)
    tn, Np = _tile_and_pad(N, tn_cap, 128)
    tk, Kp = _tile_and_pad(K, tk_cap, 128)

    xp = _pad2(x, Mp, Kp)
    wp = _pad2(w_bf16, Kp, Np)
    bp = _pad2(b_f32.reshape(1, N), 1, Np)

    out = pl.pallas_call(
        _mm_kernel,
        out_shape=jax.ShapeDtypeStruct((Mp, Np), out_dtype),
        grid=(Mp // tm, Np // tn, Kp // tk),
        in_specs=[
            pl.BlockSpec((tm, tk), lambda i, j, k: (i, k)),
            pl.BlockSpec((tk, tn), lambda i, j, k: (k, j)),
            pl.BlockSpec((1, tn), lambda i, j, k: (0, j)),
        ],
        out_specs=pl.BlockSpec((tm, tn), lambda i, j, k: (i, j)),
        scratch_shapes=[pltpu.VMEM((tm, tn), jnp.float32)],
        compiler_params=pltpu.CompilerParams(
            dimension_semantics=("parallel", "parallel", "arbitrary"),
            vmem_limit_bytes=_VMEM_LIMIT),
    )(xp, wp, bp)
    if (Mp, Np) != (M, N):
        out = out[:M, :N]
    return out


def linear_layernorm(x, w_bf16, b_f32, gamma_f32, beta_f32, *, eps=1e-5,
                     out_dtype=None, tm_cap=512, tk_cap=1024):
    """Fused (x @ w + b) then LayerNorm over the output channels.
    Output width is kept as a single block (needed for the row-wise LN reduction)."""
    M, K = x.shape
    N = w_bf16.shape[1]
    out_dtype = out_dtype or x.dtype
    tm, Mp = _tile_and_pad(M, tm_cap, 8)
    tk, Kp = _tile_and_pad(K, tk_cap, 128)

    xp = _pad2(x, Mp, Kp)
    wp = _pad2(w_bf16, Kp, N)
    bp = b_f32.reshape(1, N)
    gp = gamma_f32.reshape(1, N)
    bep = beta_f32.reshape(1, N)

    out = pl.pallas_call(
        functools.partial(_mm_ln_kernel, eps=eps),
        out_shape=jax.ShapeDtypeStruct((Mp, N), out_dtype),
        grid=(Mp // tm, Kp // tk),
        in_specs=[
            pl.BlockSpec((tm, tk), lambda i, k: (i, k)),
            pl.BlockSpec((tk, N), lambda i, k: (k, 0)),
            pl.BlockSpec((1, N), lambda i, k: (0, 0)),
            pl.BlockSpec((1, N), lambda i, k: (0, 0)),
            pl.BlockSpec((1, N), lambda i, k: (0, 0)),
        ],
        out_specs=pl.BlockSpec((tm, N), lambda i, k: (i, 0)),
        scratch_shapes=[pltpu.VMEM((tm, N), jnp.float32)],
        compiler_params=pltpu.CompilerParams(
            dimension_semantics=("parallel", "arbitrary"),
            vmem_limit_bytes=_VMEM_LIMIT),
    )(xp, wp, bp, gp, bep)
    if Mp != M:
        out = out[:M, :]
    return out


def attention_fused(x, kv, q_w, q_b, p_w, p_b, num_heads):
    """x: (B, Nq, C) tokens, kv: (B, Nk, 2C) bf16 -> (B, Nq, C).
    Fuses the q projection, per-head softmax attention and the output projection."""
    B, Nq, C = x.shape
    Nk = kv.shape[1]
    assert C % num_heads == 0
    hd = C // num_heads
    tq = _pick_q_tile(Nq)

    # TODO(synk): for non-PVT configs with very large Nk*C (sr=1 at big N) on v7x's
    # 64 MiB VMEM, the resident (1, Nk, 2C) kv block + (tq, Nk) scores should be
    # Nk-tiled with an online-softmax accumulator (and/or pl.Buffered(1) on kv);
    # PCPVT keeps Nk = (H/sr)*(W/sr) small so the full kv block is fine here.
    kernel = functools.partial(_attn_kernel, num_heads=num_heads, head_dim=hd)
    return pl.pallas_call(
        kernel,
        out_shape=jax.ShapeDtypeStruct((B, Nq, C), x.dtype),
        grid=(B, Nq // tq),
        in_specs=[
            pl.BlockSpec((1, tq, C), lambda b, i: (b, i, 0)),
            pl.BlockSpec((1, Nk, 2 * C), lambda b, i: (b, 0, 0)),
            pl.BlockSpec((C, C), lambda b, i: (0, 0)),
            pl.BlockSpec((1, C), lambda b, i: (0, 0)),
            pl.BlockSpec((C, C), lambda b, i: (0, 0)),
            pl.BlockSpec((1, C), lambda b, i: (0, 0)),
        ],
        out_specs=pl.BlockSpec((1, tq, C), lambda b, i: (b, i, 0)),
        scratch_shapes=[
            pltpu.VMEM((num_heads, Nk, hd), jnp.bfloat16),   # per-head k (hoisted)
            pltpu.VMEM((num_heads, Nk, hd), jnp.bfloat16),   # per-head v (hoisted)
            pltpu.VMEM((tq, C), jnp.float32),                # concatenated head outputs
        ],
        # q axis is "arbitrary": the per-batch k/v scratches are filled at q-tile 0 and
        # reused by later q-tiles of the same batch (batch axis stays "parallel" so the
        # two v7x TensorCores each get whole batches).
        compiler_params=pltpu.CompilerParams(
            dimension_semantics=("parallel", "arbitrary"),
            vmem_limit_bytes=_VMEM_LIMIT),
    )(x, kv, q_w, q_b, p_w, p_b)


# --------------------------------------------------------------------------- module

class PallasAttention:
    """JAX/Pallas port of lib/models/backbones/pvt/pcpvt_backbone.Attention."""

    def __init__(self, dim, num_heads=8, qkv_bias=False, qk_scale=None, sr_ratio=1,
                 key=jax.random.PRNGKey(0), dtype=jnp.float32):
        assert dim % num_heads == 0
        self.dim = dim
        self.num_heads = num_heads
        self.head_dim = dim // num_heads
        self.scale = qk_scale or self.head_dim ** (-0.5)
        self.sr_ratio = sr_ratio

        ks = jax.random.split(key, 8)
        init = lambda k, shape: (0.02 * jax.random.normal(k, shape)).astype(dtype)

        # f32 reference copies (torch Linear semantics: x @ W with W stored (in, out)).
        self.q_w = init(ks[0], (dim, dim))
        self.q_b = init(ks[1], (dim,)) if qkv_bias else jnp.zeros((dim,), dtype)
        self.kv_w = init(ks[2], (dim, 2 * dim))
        self.kv_b = init(ks[3], (2 * dim,)) if qkv_bias else jnp.zeros((2 * dim,), dtype)
        self.proj_w = init(ks[4], (dim, dim))
        self.proj_b = init(ks[5], (dim,))

        # Kernel-side copies: bf16 matmul operands, f32 biases, attention scale folded
        # into the q projection (zero runtime cost).
        self.q_w_k = (self.q_w * self.scale).astype(jnp.bfloat16)
        self.q_b_k = (self.q_b * self.scale).astype(jnp.float32).reshape(1, dim)
        self.kv_w_k = self.kv_w.astype(jnp.bfloat16)
        self.kv_b_k = self.kv_b.astype(jnp.float32)
        self.proj_w_k = self.proj_w.astype(jnp.bfloat16)
        self.proj_b_k = self.proj_b.astype(jnp.float32).reshape(1, dim)

        if sr_ratio > 1:
            # torch Conv2d weight: (out_C, in_C, kh, kw). Flatten (in_C, kh, kw)
            # row-major -> patch vector order (c, kh, kw); store as (C*sr*sr, C).
            sr_w_torch = init(ks[6], (dim, dim, sr_ratio, sr_ratio))
            self.sr_w = sr_w_torch.reshape(dim, dim * sr_ratio * sr_ratio).T
            self.sr_b = init(ks[7], (dim,))
            self.norm_w = jnp.ones((dim,), jnp.float32)
            self.norm_b = jnp.zeros((dim,), jnp.float32)
            self.sr_w_k = self.sr_w.astype(jnp.bfloat16)
            self.sr_b_k = self.sr_b.astype(jnp.float32)

        # attn_drop / proj_drop default to p=0.0 -> identity (omitted).

    def __call__(self, x, H, W):
        B, N, C = x.shape
        sr = self.sr_ratio
        assert N == H * W

        # ---- k/v source (optional spatial-reduction conv + fused LayerNorm) ---------
        if sr > 1:
            Hs, Ws = H // sr, W // sr
            # non-overlapping sr x sr conv == patch extraction + matmul (+ fused LN)
            patches = x.reshape(B, Hs, sr, Ws, sr, C)
            patches = patches.transpose(0, 1, 3, 5, 2, 4)        # (B,Hs,Ws,C,kh,kw)
            patches = patches.reshape(B * Hs * Ws, C * sr * sr)
            x_red = linear_layernorm(patches, self.sr_w_k, self.sr_b_k,
                                     self.norm_w, self.norm_b,
                                     out_dtype=jnp.bfloat16)     # (B*Nk, C) bf16
            Nk = Hs * Ws
        else:
            x_red = x.reshape(B * N, C)
            Nk = N

        # kv kept as one (B, Nk, 2C) bf16 tensor; the attention kernel lane-slices
        # k/v per head (the (2, B, nh, Nk, hd) permute is never materialized).
        kv = linear(x_red, self.kv_w_k, self.kv_b_k,
                    out_dtype=jnp.bfloat16).reshape(B, Nk, 2 * C)

        # ---- fused q-projection + attention + output projection ---------------------
        return attention_fused(x, kv, self.q_w_k, self.q_b_k,
                               self.proj_w_k, self.proj_b_k, self.num_heads)


# --------------------------------------------------------------------------- reference

def _reference(x, H, W, m):
    """Pure-JAX f32 mirror of the PyTorch forward (for correctness checking)."""
    B, N, C = x.shape
    nh, hd, sr = m.num_heads, m.head_dim, m.sr_ratio
    q = (x @ m.q_w + m.q_b).reshape(B, N, nh, hd).transpose(0, 2, 1, 3)
    if sr > 1:
        Hs, Ws = H // sr, W // sr
        p = x.reshape(B, Hs, sr, Ws, sr, C).transpose(0, 1, 3, 5, 2, 4)
        p = p.reshape(B, Hs * Ws, C * sr * sr)
        xr = p @ m.sr_w + m.sr_b
        mu = xr.mean(-1, keepdims=True)
        var = ((xr - mu) ** 2).mean(-1, keepdims=True)
        xr = (xr - mu) * jax.lax.rsqrt(var + 1e-5) * m.norm_w + m.norm_b
    else:
        xr = x
    kv = xr @ m.kv_w + m.kv_b
    Nk = kv.shape[1]
    kv = kv.reshape(B, Nk, 2, nh, hd).transpose(2, 0, 3, 1, 4)
    k, v = kv[0], kv[1]
    s = jnp.einsum('bhqd,bhkd->bhqk', q, k) * m.scale
    pr = jax.nn.softmax(s, axis=-1)
    o = jnp.einsum('bhqk,bhkd->bhqd', pr, v).transpose(0, 2, 1, 3).reshape(B, N, C)
    return o @ m.proj_w + m.proj_b


# --------------------------------------------------------------------------- main

if __name__ == "__main__":
    B, C, H, W = 2, 32, 8, 8
    N = H * W
    num_heads = 4

    key = jax.random.PRNGKey(0)
    k_param, k_x = jax.random.split(key)
    x = jax.random.normal(k_x, (B, N, C), dtype=jnp.float32)

    for sr_ratio in (2, 1):  # exercise both the spatial-reduction and the plain path
        attn = PallasAttention(dim=C, num_heads=num_heads, qkv_bias=False,
                               sr_ratio=sr_ratio, key=k_param)
        y = jax.block_until_ready(attn(x, H, W))
        assert y.shape == (B, N, C), y.shape
        assert bool(jnp.all(jnp.isfinite(y)))
        y_ref = _reference(x, H, W, attn)
        err = float(jnp.max(jnp.abs(y - y_ref)))
        assert jnp.allclose(y, y_ref, rtol=2e-2, atol=2e-2), (sr_ratio, err)

    print("KERNEL_OK")
</pallas_src>

<mosaic_0001>
module attributes {stable_mosaic.version = 11 : i64} {
  func.func @_mm_ln_kernel(%arg0: i32, %arg1: i32, %arg2: memref<32x128xf32, #tpu.memory_space<vmem>>, %arg3: memref<128x32xbf16, #tpu.memory_space<vmem>>, %arg4: memref<1x32xf32, #tpu.memory_space<vmem>>, %arg5: memref<1x32xf32, #tpu.memory_space<vmem>>, %arg6: memref<1x32xf32, #tpu.memory_space<vmem>>, %arg7: memref<32x32xbf16, #tpu.memory_space<vmem>>, %arg8: memref<32x32xf32, #tpu.memory_space<vmem>>) attributes {dimension_semantics = [#tpu.dimension_semantics<parallel>, #tpu.dimension_semantics<arbitrary>], iteration_bounds = array<i64: 1, 1>, scalar_prefetch = 0 : i64, scratch_operands = 1 : i64, tpu.core_type = #tpu.core_type<tc>, window_params = [{transform_indices = @transform_0, window_bounds = array<i64: 32, 128>}, {transform_indices = @transform_1, window_bounds = array<i64: 128, 32>}, {pipeline_mode = #tpu.pipeline_mode<synchronous>, transform_indices = @transform_2, window_bounds = array<i64: 1, 32>}, {pipeline_mode = #tpu.pipeline_mode<synchronous>, transform_indices = @transform_3, window_bounds = array<i64: 1, 32>}, {pipeline_mode = #tpu.pipeline_mode<synchronous>, transform_indices = @transform_4, window_bounds = array<i64: 1, 32>}, {transform_indices = @transform_5, window_bounds = array<i64: 32, 32>}]} {
    %c0_i32 = arith.constant 0 : i32
    %0 = arith.cmpi eq, %arg1, %c0_i32 : i32
    %1 = arith.extui %0 : i1 to i32
    %c0_i32_0 = arith.constant 0 : i32
    %2 = arith.cmpi ne, %1, %c0_i32_0 : i32
    scf.if %2 {
      %cst_10 = arith.constant 0.000000e+00 : f32
      %13 = vector.broadcast %cst_10 : f32 to vector<32x32xf32>
      %c0_11 = arith.constant 0 : index
      %c0_12 = arith.constant 0 : index
      %14 = vector.load %arg8[%c0_11, %c0_12] : memref<32x32xf32, #tpu.memory_space<vmem>>, vector<32x32xf32>
      tpu.vector_store %arg8[%c0_11, %c0_12], %13 {strides = array<i32>} : memref<32x32xf32, #tpu.memory_space<vmem>>, vector<32x32xf32>,
    } else {
    }
    %c0 = arith.constant 0 : index
    %c0_1 = arith.constant 0 : index
    %3 = vector.load %arg8[%c0, %c0_1] : memref<32x32xf32, #tpu.memory_space<vmem>>, vector<32x32xf32>
    %c0_2 = arith.constant 0 : index
    %c0_3 = arith.constant 0 : index
    %4 = vector.load %arg2[%c0_2, %c0_3] : memref<32x128xf32, #tpu.memory_space<vmem>>, vector<32x128xf32>
    %5 = arith.truncf %4 : vector<32x128xf32> to vector<32x128xbf16>
    %c0_4 = arith.constant 0 : index
    %c0_5 = arith.constant 0 : index
    %6 = vector.load %arg3[%c0_4, %c0_5] : memref<128x32xbf16, #tpu.memory_space<vmem>>, vector<128x32xbf16>
    %cst = arith.constant dense<0.000000e+00> : vector<32x32xf32>
    %7 = tpu.matmul %5, %6, %cst {dimension_numbers = #tpu.dot_dimension_numbers<[1], [0], [0], [1], [0, 0, 1, 1], [], []>} : vector<32x128xbf16>, vector<128x32xbf16>, vector<32x32xf32> -> vector<32x32xf32>
    %8 = arith.addf %3, %7 : vector<32x32xf32>
    %c0_6 = arith.constant 0 : index
    %c0_7 = arith.constant 0 : index
    %9 = vector.load %arg8[%c0_6, %c0_7] : memref<32x32xf32, #tpu.memory_space<vmem>>, vector<32x32xf32>
    tpu.vector_store %arg8[%c0_6, %c0_7], %8 {strides = array<i32>} : memref<32x32xf32, #tpu.memory_space<vmem>>, vector<32x32xf32>,
    %c0_i32_8 = arith.constant 0 : i32
    %10 = arith.cmpi eq, %arg1, %c0_i32_8 : i32
    %11 = arith.extui %10 : i1 to i32
    %c0_i32_9 = arith.constant 0 : i32
    %12 = arith.cmpi ne, %11, %c0_i32_9 : i32
    scf.if %12 {
      %c0_10 = arith.constant 0 : index
      %c0_11 = arith.constant 0 : index
      %13 = vector.load %arg8[%c0_10, %c0_11] : memref<32x32xf32, #tpu.memory_space<vmem>>, vector<32x32xf32>
      %c0_12 = arith.constant 0 : index
      %c0_13 = arith.constant 0 : index
      %14 = vector.load %arg4[%c0_12, %c0_13] : memref<1x32xf32, #tpu.memory_space<vmem>>, vector<1x32xf32>
      %15 = vector.broadcast %14 : vector<1x32xf32> to vector<32x32xf32>
      %16 = arith.addf %13, %15 : vector<32x32xf32>
      %cst_14 = arith.constant dense<0.000000e+00> : vector<32xf32>
      %17 = vector.multi_reduction <add>, %16, %cst_14 [1] : vector<32x32xf32> to vector<32xf32>
      %18 = vector.shape_cast %17 : vector<32xf32> to vector<32x1xf32>
      %cst_15 = arith.constant 3.200000e+01 : f32
      %19 = vector.broadcast %cst_15 : f32 to vector<32x1xf32>
      %20 = arith.divf %18, %19 : vector<32x1xf32>
      %21 = vector.broadcast %20 : vector<32x1xf32> to vector<32x32xf32>
      %22 = arith.subf %16, %21 : vector<32x32xf32>
      %23 = arith.mulf %22, %22 : vector<32x32xf32>
      %cst_16 = arith.constant dense<0.000000e+00> : vector<32xf32>
      %24 = vector.multi_reduction <add>, %23, %cst_16 [1] : vector<32x32xf32> to vector<32xf32>
      %25 = vector.shape_cast %24 : vector<32xf32> to vector<32x1xf32>
      %cst_17 = arith.constant 3.200000e+01 : f32
      %26 = vector.broadcast %cst_17 : f32 to vector<32x1xf32>
      %27 = arith.divf %25, %26 : vector<32x1xf32>
      %28 = vector.broadcast %20 : vector<32x1xf32> to vector<32x32xf32>
      %29 = arith.subf %16, %28 : vector<32x32xf32>
      %cst_18 = arith.constant 9.99999974E-6 : f32
      %30 = vector.broadcast %cst_18 : f32 to vector<32x1xf32>
      %31 = arith.addf %27, %30 : vector<32x1xf32>
      %32 = math.rsqrt %31 : vector<32x1xf32>
      %33 = vector.broadcast %32 : vector<32x1xf32> to vector<32x32xf32>
      %34 = arith.mulf %29, %33 : vector<32x32xf32>
      %c0_19 = arith.constant 0 : index
      %c0_20 = arith.constant 0 : index
      %35 = vector.load %arg5[%c0_19, %c0_20] : memref<1x32xf32, #tpu.memory_space<vmem>>, vector<1x32xf32>
      %36 = vector.broadcast %35 : vector<1x32xf32> to vector<32x32xf32>
      %37 = arith.mulf %34, %36 : vector<32x32xf32>
      %c0_21 = arith.constant 0 : index
      %c0_22 = arith.constant 0 : index
      %38 = vector.load %arg6[%c0_21, %c0_22] : memref<1x32xf32, #tpu.memory_space<vmem>>, vector<1x32xf32>
      %39 = vector.broadcast %38 : vector<1x32xf32> to vector<32x32xf32>
      %40 = arith.addf %37, %39 : vector<32x32xf32>
      %41 = arith.truncf %40 : vector<32x32xf32> to vector<32x32xbf16>
      %c0_23 = arith.constant 0 : index
      %c0_24 = arith.constant 0 : index
      %42 = vector.load %arg7[%c0_23, %c0_24] : memref<32x32xbf16, #tpu.memory_space<vmem>>, vector<32x32xbf16>
      tpu.vector_store %arg7[%c0_23, %c0_24], %41 {strides = array<i32>} : memref<32x32xbf16, #tpu.memory_space<vmem>>, vector<32x32xbf16>,
    } else {
    }
    return
  }
  func.func @transform_0(%arg0: i32, %arg1: i32) -> (i32, i32) {
    %c0_i32 = arith.constant 0 : i32
    return %arg0, %arg1 : i32, i32
  }
  func.func @transform_1(%arg0: i32, %arg1: i32) -> (i32, i32) {
    %c0_i32 = arith.constant 0 : i32
    %c0_i32_0 = arith.constant 0 : i32
    return %arg1, %c0_i32 : i32, i32
  }
  func.func @transform_2(%arg0: i32, %arg1: i32) -> (i32, i32) {
    %c0_i32 = arith.constant 0 : i32
    %c0_i32_0 = arith.constant 0 : i32
    %c0_i32_1 = arith.constant 0 : i32
    return %c0_i32, %c0_i32_0 : i32, i32
  }
  func.func @transform_3(%arg0: i32, %arg1: i32) -> (i32, i32) {
    %c0_i32 = arith.constant 0 : i32
    %c0_i32_0 = arith.constant 0 : i32
    %c0_i32_1 = arith.constant 0 : i32
    return %c0_i32, %c0_i32_0 : i32, i32
  }
  func.func @transform_4(%arg0: i32, %arg1: i32) -> (i32, i32) {
    %c0_i32 = arith.constant 0 : i32
    %c0_i32_0 = arith.constant 0 : i32
    %c0_i32_1 = arith.constant 0 : i32
    return %c0_i32, %c0_i32_0 : i32, i32
  }
  func.func @transform_5(%arg0: i32, %arg1: i32) -> (i32, i32) {
    %c0_i32 = arith.constant 0 : i32
    %c0_i32_0 = arith.constant 0 : i32
    return %arg0, %c0_i32 : i32, i32
  }
}

</mosaic_0001>

<bundles_post_ra>
// kernel: tpu_custom_call.1
= control target key start
LH: loop header
LB: loop body
LE: loop exit
PB: predicated region body
PF: predicated region fallthrough
CT: control target
= control target key end

     0   :  { %vm25_vm0 = vcmask 261120   ;;  %v377_v2 = vmov 0.0   ;;  %s495_s0 = inlined_call_operand.vmem [shape: f32[32,128], index: 0, kind: input, shape index: {}]   ;;  %s496_s1 = inlined_call_operand.vmem [shape: bf16[128,32], index: 1, kind: input, shape index: {}]   ;;  %s497_s2 = inlined_call_operand.vmem [shape: f32[1,32], index: 2, kind: input, shape index: {}]   ;;  %s498_s3 = inlined_call_operand.vmem [shape: f32[1,32], index: 3, kind: input, shape index: {}]   ;;  %s499_s4 = inlined_call_operand.vmem [shape: f32[1,32], index: 4, kind: input, shape index: {}]   ;;  %s500_s5 = inlined_call_operand.hbm [shape: bf16[32,32], index: 5, kind: output, shape index: {}]  }
   0x1   :  { %v324_v0 = vld [vmem:[%s496_s1 + $0x38] sm:$0xff]  ;;  %v323_v1 = vld [vmem:[%s496_s1 + $0x30] sm:$0xff]  ;;  %26 = vst.msk [vmem:[#allocation2] sm:$0xff] %vm25_vm0, %v377_v2 }
   0x2   :  { %104 = vmatpush.bf16.msra.mxu0 %v324_v0  ;;  %325 = vmatpush.bf16.msra.mxu1 %v324_v0  ;;  %27 = vst.msk [vmem:[#allocation2 + $0x8] sm:$0xff] %vm25_vm0, %v377_v2 }
   0x3   :  { %28 = vst.msk [vmem:[#allocation2 + $0x10] sm:$0xff] %vm25_vm0, %v377_v2 }
   0x4   :  { %29 = vst.msk [vmem:[#allocation2 + $0x18] sm:$0xff] %vm25_vm0, %v377_v2 }
   0x5   :  { %10 = vsyncpa [#allocation4], 0  ;;  %v322_v3 = vld [vmem:[%s496_s1 + $0x28] sm:$0xff]  ;;  %v321_v4 = vld [vmem:[%s496_s1 + $0x20] sm:$0xff]  ;;  %v378_v40 = vmov 32.0   ;;  %vm262_vm10 = vcmask 257024  }
   0x6   :  { %105 = vmatpush.bf16.msra.mxu0 %v323_v1  ;;  %326 = vmatpush.bf16.msra.mxu1 %v323_v1  ;;  %v320_v5 = vld [vmem:[%s496_s1 + $0x18] sm:$0xff]  ;;  %v319_v6 = vld [vmem:[%s496_s1 + $0x10] sm:$0xff]  ;;  %v318_v7 = vld [vmem:[%s496_s1 + $0x8] sm:$0xff]  ;;  %341 = vrcp.f32 %v378_v40  ;;  %s273_s22 = sshll.u32 %s500_s5, 4  ;;  %s380_s23 = smov 64   ;;  %s274_s22 = int_to_ptr.hbm [resolvable:$true] %s273_s22 }
   0x7   :  { %v317_v8 = vld [vmem:[%s496_s1] sm:$0xff]  ;;  %v35_v10 = vld [vmem:[%s495_s0 + $0x8] sm:$0xff]  ;;  %v36_v11 = vld [vmem:[%s495_s0 + $0x10] sm:$0xff]  ;;  %s381_s24 = smov 4  }
   0x8   :  { %v34_v9 = vld [vmem:[%s495_s0] sm:$0xff]  ;;  %v37_v12 = vld [vmem:[%s495_s0 + $0x18] sm:$0xff] }
   0x9   :  { %v38_v13 = vpack.c.bf16 %v35_v10, %v34_v9  ;;  %v39_v14 = vpack.c.bf16 %v37_v12, %v36_v11  ;;  %v30_v15 = vld [vmem:[#allocation2] sm:$0xff]  ;;  %v31_v21 = vld [vmem:[#allocation2 + $0x8] sm:$0xff] }
   0xa   :  { %106 = vmatpush.bf16.msra.mxu0 %v322_v3  ;;  %327 = vmatpush.bf16.msra.mxu1 %v322_v3  ;;  %v32_v16 = vld [vmem:[#allocation2 + $0x10] sm:$0xff]  ;;  %v338_v23 = vld [vmem:[%s497_s2] ss:$0 sm:$0xff] }
   0xb   :  { %v33_v22 = vld [vmem:[#allocation2 + $0x18] sm:$0xff] }
   0xc   :  { %v342_v41 = vpop.eup %341 }
   0xd   :  { %v160_v42 = vmul.f32 32.0, %v342_v41  ;;  %vm164_vm1 = vweird.f32 %v342_v41 }
   0xe   :  { %107 = vmatpush.bf16.msra.mxu0 %v321_v4  ;;  %328 = vmatpush.bf16.msra.mxu1 %v321_v4 }
   0xf   :  { %v161_v43 = vsub.f32 1.0, %v160_v42 }
  0x11   :  { %v162_v44 = vmul.f32 %v342_v41, %v161_v43 }
  0x12   :  { %108 = vmatpush.bf16.msra.mxu0 %v320_v5  ;;  %329 = vmatpush.bf16.msra.mxu1 %v320_v5 }
  0x13   :  { %v163_v45 = vadd.f32 %v342_v41, %v162_v44 }
  0x15   :  { %v165_v46 = vsel %vm164_vm1, %v342_v41, %v163_v45 }
  0x16   :  { %109 = vmatpush.bf16.msra.mxu0 %v319_v6  ;;  %330 = vmatpush.bf16.msra.mxu1 %v319_v6 }
  0x1a   :  { %110 = vmatpush.bf16.msra.mxu0 %v318_v7  ;;  %331 = vmatpush.bf16.msra.mxu1 %v318_v7 }
  0x1e   :  { %111 = vmatpush.bf16.msra.mxu0 %v317_v8  ;;  %332 = vmatpush.bf16.msra.mxu1 %v317_v8 }
  0x21   :  { %112 = vmatmul.bf16.vlgmr.msra.gmra.mxu0 %v38_v13  ;;  %117 = vmatmul.bf16.vlgmr.msra.gmra.mxu1 %v39_v14 }
  0x9e   :  { %v113_v17 = vpop.f32.mrf.mxu0  ;;  %v118_v18 = vpop.f32.mrf.mxu1 }
  0x9f   :  { %v123_v19 = vadd.f32 %v113_v17, %v30_v15  ;;  %v125_v20 = vadd.f32 %v118_v18, %v32_v16 }
  0xa1   :  { %128 = vst.msk [vmem:[#allocation2] sm:$0xff] %vm25_vm0, %v123_v19 }
  0xa2   :  { %130 = vst.msk [vmem:[#allocation2 + $0x10] sm:$0xff] %vm25_vm0, %v125_v20 }
  0xa6   :  { %v115_v24 = vpop.f32.mrf.mxu0  ;;  %v120_v25 = vpop.f32.mrf.mxu1 }
  0xa7   :  { %v124_v26 = vadd.f32 %v115_v24, %v31_v21  ;;  %v126_v27 = vadd.f32 %v120_v25, %v33_v22 }
  0xa8   :  { %v135_v28 = vld [vmem:[#allocation2] sm:$0xff] }
  0xa9   :  { %129 = vst.msk [vmem:[#allocation2 + $0x8] sm:$0xff] %vm25_vm0, %v124_v26  ;;  %v137_v29 = vld [vmem:[#allocation2 + $0x10] sm:$0xff]  ;;  %v143_v30 = vadd.f32 %v338_v23, %v135_v28 }
  0xaa   :  { %131 = vst.msk [vmem:[#allocation2 + $0x18] sm:$0xff] %vm25_vm0, %v126_v27  ;;  %v145_v31 = vadd.f32 %v338_v23, %v137_v29  ;;  %v339_v29 = vld [vmem:[%s498_s3] ss:$0 sm:$0xff]  ;;  %s379_s3 = smov [#allocation3]  }
  0xab   :  { %v147_v32 = vsel %vm25_vm0, %v143_v30, 0.0 }
  0xac   :  { %v153_v33 = vsel %vm25_vm0, %v145_v31, 0.0  ;;  %148 = vadd.xlane.f32.xlu0 %v147_v32 }
  0xad   :  { %154 = vadd.xlane.f32.xlu1 %v153_v33 }
  0xb0   :  { %v136_v34 = vld [vmem:[#allocation2 + $0x8] sm:$0xff] }
  0xb1   :  { %v138_v35 = vld [vmem:[#allocation2 + $0x18] sm:$0xff]  ;;  %v144_v36 = vadd.f32 %v338_v23, %v136_v34  ;;  %v340_v34 = vld [vmem:[%s499_s4] ss:$0 sm:$0xff]  ;;  %s271_s4 = sshll.u32 %s379_s3, 4  ;;  %s272_s4 = int_to_ptr.vmem [resolvable:$true] %s271_s4 }
  0xb2   :  { %v146_v37 = vadd.f32 %v338_v23, %v138_v35 }
  0xb3   :  { %v150_v38 = vsel %vm25_vm0, %v144_v36, 0.0 }
  0xb4   :  { %v156_v39 = vsel %vm25_vm0, %v146_v37, 0.0  ;;  %151 = vadd.xlane.f32.xlu0 %v150_v38 }
  0xb5   :  { %157 = vadd.xlane.f32.xlu1 %v156_v39 }
 0x11f   :  { %v149_v47 = vpop.xlane.xlu0 %148 }
 0x120   :  { %v155_v48 = vpop.xlane.xlu1 %154  ;;  %v166_v49 = vmul.f32 %v165_v46, %v149_v47 }
 0x121   :  { %v168_v50 = vmul.f32 %v165_v46, %v155_v48 }
 0x122   :  { %v170_v51 = vsub.f32 %v143_v30, %v166_v49 }
 0x123   :  { %v463_v52 = vsub.f32 %v145_v31, %v168_v50 }
 0x124   :  { %v174_v53 = vmul.f32 %v170_v51, %v170_v51 }
 0x125   :  { %v176_v54 = vmul.f32 %v463_v52, %v463_v52 }
 0x126   :  { %v178_v55 = vsel %vm25_vm0, %v174_v53, 0.0 }
 0x127   :  { %v184_v56 = vsel %vm25_vm0, %v176_v54, 0.0  ;;  %179 = vadd.xlane.f32.xlu2 %v178_v55  ;;  %v152_v57 = vpop.xlane.xlu0 %151 }
 0x128   :  { %v158_v58 = vpop.xlane.xlu1 %157  ;;  %185 = vadd.xlane.f32.xlu0 %v184_v56  ;;  %v167_v59 = vmul.f32 %v165_v46, %v152_v57 }
 0x129   :  { %v169_v60 = vmul.f32 %v165_v46, %v158_v58 }
 0x12a   :  { %v469_v61 = vsub.f32 %v144_v36, %v167_v59 }
 0x12b   :  { %v471_v62 = vsub.f32 %v146_v37, %v169_v60 }
 0x12c   :  { %v175_v63 = vmul.f32 %v469_v61, %v469_v61 }
 0x12d   :  { %v177_v0 = vmul.f32 %v471_v62, %v471_v62 }
 0x12e   :  { %v181_v1 = vsel %vm25_vm0, %v175_v63, 0.0 }
 0x12f   :  { %v187_v2 = vsel %vm25_vm0, %v177_v0, 0.0  ;;  %182 = vadd.xlane.f32.xlu2 %v181_v1 }
 0x130   :  { %188 = vadd.xlane.f32.xlu1 %v187_v2 }
 0x19a   :  { %v180_v3 = vpop.xlane.xlu2 %179 }
 0x19b   :  { %v190_v4 = vmul.f32 %v180_v3, %v165_v46  ;;  %v186_v5 = vpop.xlane.xlu0 %185 }
 0x19c   :  { %v192_v6 = vmul.f32 %v186_v5, %v165_v46 }
 0x19d   :  { %v194_v7 = vadd.f32 1e-05, %v190_v4 }
 0x19e   :  { %v196_v8 = vadd.f32 1e-05, %v192_v6 }
 0x19f   :  { %343 = vrsqrt.f32 %v194_v7  ;;  %vm204_vm4 = vweird.f32 %v194_v7 }
 0x1a0   :  { %345 = vrsqrt.f32 %v196_v8  ;;  %vm224_vm6 = vweird.f32 %v196_v8 }
 0x1a2   :  { %v183_v9 = vpop.xlane.xlu2 %182 }
 0x1a3   :  { %v189_v10 = vpop.xlane.xlu1 %188  ;;  %v191_v11 = vmul.f32 %v183_v9, %v165_v46 }
 0x1a4   :  { %v193_v12 = vmul.f32 %v189_v10, %v165_v46 }
 0x1a5   :  { %v344_v13 = vpop.eup %343  ;;  %v195_v14 = vadd.f32 1e-05, %v191_v11 }
 0x1a6   :  { %v346_v15 = vpop.eup %345  ;;  %v199_v16 = vmul.f32 %v344_v13, %v194_v7  ;;  %v197_v17 = vadd.f32 1e-05, %v193_v12  ;;  %vm205_vm2 = vweird.f32 %v344_v13 }
 0x1a7   :  { %v219_v18 = vmul.f32 %v346_v15, %v196_v8  ;;  %347 = vrsqrt.f32 %v195_v14  ;;  %vm225_vm3 = vweird.f32 %v346_v15  ;;  %vm206_vm5 = vmor %vm204_vm4, %vm205_vm2  ;;  %vm214_vm11 = vweird.f32 %v195_v14 }
 0x1a8   :  { %v200_v19 = vmul.f32 %v344_v13, %v199_v16  ;;  %349 = vrsqrt.f32 %v197_v17  ;;  %vm226_vm7 = vmor %vm224_vm6, %vm225_vm3  ;;  %vm234_vm12 = vweird.f32 %v197_v17 }
 0x1a9   :  { %v220_v20 = vmul.f32 %v346_v15, %v219_v18 }
 0x1aa   :  { %v201_v21 = vmul.f32 0.5, %v200_v19 }
 0x1ab   :  { %v221_v22 = vmul.f32 0.5, %v220_v20 }
 0x1ac   :  { %v202_v23 = vsub.f32 1.5, %v201_v21 }
 0x1ad   :  { %v348_v24 = vpop.eup %347  ;;  %v222_v25 = vsub.f32 1.5, %v221_v22 }
 0x1ae   :  { %v350_v26 = vpop.eup %349  ;;  %v203_v27 = vmul.f32 %v344_v13, %v202_v23  ;;  %v209_v28 = vmul.f32 %v348_v24, %v195_v14  ;;  %vm215_vm8 = vweird.f32 %v348_v24 }
 0x1af   :  { %v223_v30 = vmul.f32 %v346_v15, %v222_v25  ;;  %v229_v31 = vmul.f32 %v350_v26, %v197_v17  ;;  %vm235_vm9 = vweird.f32 %v350_v26  ;;  %vm216_vm13 = vmor %vm214_vm11, %vm215_vm8 }
 0x1b0   :  { %v207_v32 = vsel %vm206_vm5, %v344_v13, %v203_v27  ;;  %v210_v33 = vmul.f32 %v348_v24, %v209_v28  ;;  %vm236_vm14 = vmor %vm234_vm12, %vm235_vm9 }
 0x1b1   :  { %v238_v35 = vmul.f32 %v207_v32, %v170_v51  ;;  %v227_v36 = vsel %vm226_vm7, %v346_v15, %v223_v30  ;;  %v230_v37 = vmul.f32 %v350_v26, %v229_v31 }
 0x1b2   :  { %v240_v38 = vmul.f32 %v227_v36, %v463_v52  ;;  %v211_v39 = vmul.f32 0.5, %v210_v33 }
 0x1b3   :  { %v246_v40 = vmul.f32 %v339_v29, %v238_v35  ;;  %v231_v41 = vmul.f32 0.5, %v230_v37 }
 0x1b4   :  { %v248_v42 = vmul.f32 %v339_v29, %v240_v38  ;;  %v212_v43 = vsub.f32 1.5, %v211_v39 }
 0x1b5   :  { %v254_v44 = vadd.f32 %v340_v34, %v246_v40  ;;  %v232_v45 = vsub.f32 1.5, %v231_v41 }
 0x1b6   :  { %v256_v46 = vadd.f32 %v340_v34, %v248_v42  ;;  %v213_v47 = vmul.f32 %v348_v24, %v212_v43 }
 0x1b7   :  { %v258_v48 = vpack.c.bf16 %v254_v44, %v254_v44  ;;  %v233_v49 = vmul.f32 %v350_v26, %v232_v45 }
 0x1b8   :  { %v260_v50 = vpack.c.bf16 %v256_v46, %v256_v46  ;;  %v217_v51 = vsel %vm216_vm13, %v348_v24, %v213_v47 }
 0x1b9   :  { %263 = vst.msk [vmem:[#allocation3] sm:$0xf] %vm262_vm10, %v258_v48  ;;  %v237_v52 = vsel %vm236_vm14, %v350_v26, %v233_v49  ;;  %v239_v53 = vmul.f32 %v217_v51, %v469_v61 }
 0x1ba   :  { %265 = vst.msk [vmem:[#allocation3 + $0x8] sm:$0xf] %vm262_vm10, %v260_v50  ;;  %v241_v54 = vmul.f32 %v237_v52, %v471_v62 }
 0x1bb   :  { %v247_v55 = vmul.f32 %v339_v29, %v239_v53 }
 0x1bc   :  { %v249_v56 = vmul.f32 %v339_v29, %v241_v54 }
 0x1bd   :  { %v255_v57 = vadd.f32 %v340_v34, %v247_v55 }
 0x1be   :  { %v257_v58 = vadd.f32 %v340_v34, %v249_v56 }
 0x1bf   :  { %v259_v59 = vpack.c.bf16 %v255_v57, %v255_v57 }
 0x1c0   :  { %v261_v60 = vpack.c.bf16 %v257_v58, %v257_v58 }
 0x1c1   :  { %264 = vst.msk [vmem:[#allocation3 + $0x4] sm:$0xf] %vm262_vm10, %v259_v59 }
 0x1c2   :  { %266 = vst.msk [vmem:[#allocation3 + $0xc] sm:$0xf] %vm262_vm10, %v261_v60 }
 0x1c3   :  { %279 = dma.vmem_to_hbm [thread:$0]  %s272_s4, 256, %s274_s22, [#allocation4], %s380_s23, %s380_s23, %s381_s24  }
 0x1c4   :  { %375 = dma.done.wait [#allocation4], 256  }
 0x1c5   :  { %376 = vsyncadd [#allocation4], 4294967040 }
 0x1c6   :  { %284 = vsyncpa [#allocation4], 1 }

</bundles_post_ra>
